<compile_context>
chip_gen: v7x
topology: tpu7x:2x2x1
jax: 0.10.0
libtpu: 0.0.40
codegen_flags: <defaults>
</compile_context>

<pallas_src>
import functools

import jax
import jax.numpy as jnp
from jax.experimental import pallas as pl
from jax.experimental.pallas import tpu as pltpu

_LANES = 128
# 1024 rows * (128/C) samples/row = 16384 samples per task per grid step at C=8.
# Sweepable; VMEM use at 1024 rows (3 fused tasks, double-buffered) is ~10 MiB.
_MAX_TILE_ROWS = 1024


# ---------------------------------------------------------------------------
# helpers
# ---------------------------------------------------------------------------
def _round_up(x, m):
    return ((x + m - 1) // m) * m


def _pow(x, gamma):
    """x**gamma; unrolled VPU multiplies for small integer gamma (default gamma=2)."""
    g = float(gamma)
    if g.is_integer() and 0 <= g <= 8:
        out = jnp.ones_like(x)
        for _ in range(int(g)):
            out = out * x
        return out
    return jnp.power(x, g)


_ROLL_IS_JNP = None


def _roll_matches_jnp():
    """pltpu.roll is expected to follow jnp.roll semantics (out[i] = x[(i - shift) % n]).
    Verify once on the device and cache the (static) answer so the lane butterfly below can
    never silently pick the wrong partner lane.  Resolved eagerly at first wrapper call."""
    global _ROLL_IS_JNP
    if _ROLL_IS_JNP is None:
        def probe(x_ref, o_ref):
            o_ref[...] = pltpu.roll(x_ref[...], 1, 1)

        with jax.ensure_compile_time_eval():
            x = jnp.broadcast_to(
                jnp.arange(_LANES, dtype=jnp.float32)[None, :], (8, _LANES))
            y = pl.pallas_call(
                probe, out_shape=jax.ShapeDtypeStruct((8, _LANES), jnp.float32))(x)
        first = float(jax.device_get(y)[0, 0])
        if first == float(_LANES - 1):
            _ROLL_IS_JNP = True
        elif first == 1.0:
            _ROLL_IS_JNP = False
        else:
            raise RuntimeError(f"unexpected pltpu.roll behaviour: first lane = {first}")
    return _ROLL_IS_JNP


def _group_allreduce(x, op, group, roll_is_jnp):
    """All-reduce `op` within aligned groups of `group` lanes (group = num_classes, a power
    of two), result broadcast to every lane of its group.  log2(group) butterfly steps of
    pltpu.roll (XLU, idle slot here) + VPU selects — never crosses sample boundaries."""
    n = x.shape[-1]
    axis = x.ndim - 1
    lane = jax.lax.broadcasted_iota(jnp.int32, x.shape, axis)
    d = 1
    while d < group:
        if roll_is_jnp:
            from_above = pltpu.roll(x, n - d, axis)   # value of lane i + d
            from_below = pltpu.roll(x, d, axis)       # value of lane i - d
        else:
            from_above = pltpu.roll(x, d, axis)
            from_below = pltpu.roll(x, n - d, axis)
        partner = jnp.where(lane % (2 * d) < d, from_above, from_below)
        x = op(x, partner)
        d *= 2
    return x


# ---------------------------------------------------------------------------
# kernel
# ---------------------------------------------------------------------------
def _focal_sum_kernel(*refs, num_tasks, num_classes, tile_rows, tiles_per_chunk,
                      rows_valid, gamma, roll_is_jnp):
    """One (chunk, tile) grid step.  Per task: focal-loss contributions of up to
    tile_rows*(128/C) samples, accumulated into a lane-shaped VMEM scratch; the per-chunk
    scalar partial sum is produced only at the last tile of the chunk."""
    x_refs = refs[:num_tasks]
    w_refs = refs[num_tasks:2 * num_tasks]
    out_refs = refs[2 * num_tasks:3 * num_tasks]
    acc_refs = refs[3 * num_tasks:]

    chunk = pl.program_id(0)
    step = pl.program_id(1)

    @pl.when(step == 0)
    def _init():
        for acc in acc_refs:
            acc[...] = jnp.zeros_like(acc)

    # Validity mask for this block's rows.  We deliberately do NOT pad in HBM: the last block
    # of each chunk may read past the array; garbage rows are masked here.  The same mask
    # also kills the duplicated (clamped) blocks a short final chunk re-reads.
    row = jax.lax.broadcasted_iota(jnp.int32, (tile_rows, _LANES), 0)
    block = chunk * tiles_per_chunk + step
    valid = (row + block * tile_rows) < rows_valid

    for t in range(num_tasks):
        x = x_refs[t][...].astype(jnp.float32)                              # (tile_rows, 128)
        m = _group_allreduce(x, jnp.maximum, num_classes, roll_is_jnp)      # per-sample max
        z = x - m
        e = jnp.exp(z)
        s = _group_allreduce(e, jnp.add, num_classes, roll_is_jnp)          # per-sample sumexp
        lp = z - jnp.log(s)                                                 # log_softmax
        pt = e / s                                                          # exp(lp), no 2nd exp
        focal = _pow(1.0 - pt, gamma) * (-lp)
        w = w_refs[t][...].astype(jnp.float32)            # one-hot (optionally alpha-weighted)
        acc_refs[t][...] += jnp.where(valid, w * focal, 0.0)

    @pl.when(step == tiles_per_chunk - 1)
    def _finalize():
        for t in range(num_tasks):
            out_refs[t][...] = jnp.sum(acc_refs[t][...], keepdims=True)


# ---------------------------------------------------------------------------
# wrappers
# ---------------------------------------------------------------------------
def _prepare_task(logits, targets, alpha):
    """Lane-dense [rows, 128] logits slab + per-sample selection weights.
    Zero-copy (reshape only) when N is a multiple of 128/C."""
    n, c = logits.shape
    if c < 2 or c > _LANES or (c & (c - 1)) != 0:
        # TODO(synk): non-power-of-two num_classes needs a different lane grouping.
        raise NotImplementedError("num_classes must be a power of two <= 128")
    spr = _LANES // c                                    # samples per 128-lane row

    targets = jnp.asarray(targets).astype(jnp.int32)
    onehot = targets[:, None] == jnp.arange(c, dtype=jnp.int32)[None, :]

    post_scale = 1.0
    if alpha is None:
        w = onehot.astype(jnp.int8)
    elif isinstance(alpha, (int, float)):
        w = onehot.astype(jnp.int8)
        post_scale = float(alpha)                        # scalar alpha commutes with the mean
    else:
        # per-class alpha (torch.Tensor branch): fold alpha[target] into the selection weights
        alpha_vec = jnp.asarray(alpha, dtype=jnp.float32).reshape(c)
        w = jnp.where(onehot, alpha_vec[None, :], 0.0).astype(jnp.float32)

    if n % spr:
        # Only when N is not a multiple of (128/C) do we have to copy; pad to whole 32-row
        # tiles since we are copying anyway.  Padded samples get weight 0 -> contribute 0.
        n_pad = _round_up(n, spr * 32)
        logits = jnp.pad(logits, ((0, n_pad - n), (0, 0)))
        w = jnp.pad(w, ((0, n_pad - n), (0, 0)))
    rows = logits.shape[0] * c // _LANES
    x2 = logits.reshape(rows, _LANES)                    # zero-copy for contiguous input
    w2 = w.reshape(rows, _LANES)
    return x2, w2, post_scale


def _fused_focal_sums(x_list, w_list, num_classes, gamma, max_tile_rows=_MAX_TILE_ROWS):
    """One pallas_call returning the un-normalised focal-loss SUM for each task.
    All tasks must share the same [rows, 128] slab shape."""
    num_tasks = len(x_list)
    rows = x_list[0].shape[0]
    tile_rows = min(max_tile_rows, _round_up(rows, 32))  # 32 covers f32/bf16/int8 sublane tiling
    n_blocks = pl.cdiv(rows, tile_rows)
    n_chunks = 2 if n_blocks >= 2 else 1                 # v7x megacore: balance the 2 TCs
    tiles_per_chunk = pl.cdiv(n_blocks, n_chunks)
    roll_is_jnp = _roll_matches_jnp()

    def data_map(c, i):
        # Clamp so a short final chunk never addresses a fully out-of-range block; the
        # duplicated reads this causes are masked to zero inside the kernel.
        return (jnp.minimum(c * tiles_per_chunk + i, n_blocks - 1), 0)

    data_spec = pl.BlockSpec((tile_rows, _LANES), data_map)
    out_spec = pl.BlockSpec((None, 1, 1), lambda c, i: (c, 0, 0))

    kernel = functools.partial(
        _focal_sum_kernel,
        num_tasks=num_tasks, num_classes=num_classes, tile_rows=tile_rows,
        tiles_per_chunk=tiles_per_chunk, rows_valid=rows, gamma=float(gamma),
        roll_is_jnp=roll_is_jnp)

    partials = pl.pallas_call(
        kernel,
        out_shape=tuple(jax.ShapeDtypeStruct((n_chunks, 1, 1), jnp.float32)
                        for _ in range(num_tasks)),
        grid=(n_chunks, tiles_per_chunk),
        in_specs=[data_spec] * (2 * num_tasks),
        out_specs=tuple(out_spec for _ in range(num_tasks)),
        scratch_shapes=[pltpu.VMEM((tile_rows, _LANES), jnp.float32)
                        for _ in range(num_tasks)],
        compiler_params=pltpu.CompilerParams(
            dimension_semantics=("parallel", "arbitrary"),
            vmem_limit_bytes=32 * 1024 * 1024),
    )(*x_list, *w_list)
    return [jnp.sum(p) for p in partials]                # per-task focal-loss sums


def focal_loss_mean(logits, targets, gamma=2.0, alpha=None):
    """FocalLoss(alpha, gamma, reduction='mean') for a single task."""
    n, c = logits.shape
    x2, w2, post = _prepare_task(logits, targets, alpha)
    total = _fused_focal_sums([x2], [w2], c, gamma)[0]
    return total * (post / n)


def multitask_focal_loss(days_1_7_output, days_1_7,
                         days_8_14_output, days_8_14,
                         days_15_21_output, days_15_21,
                         alphas=(None, None, None),
                         gammas=(2.0, 2.0, 2.0),
                         task_weights=(1.0 / 3, 1.0 / 3, 1.0 / 3)):
    outputs = (days_1_7_output, days_8_14_output, days_15_21_output)
    targets = (days_1_7, days_8_14, days_15_21)

    fuseable = (outputs[0].shape == outputs[1].shape == outputs[2].shape
                and float(gammas[0]) == float(gammas[1]) == float(gammas[2]))
    if fuseable:
        n, c = outputs[0].shape
        preps = [_prepare_task(o, t, a) for o, t, a in zip(outputs, targets, alphas)]
        sums = _fused_focal_sums([p[0] for p in preps], [p[1] for p in preps], c, gammas[0])
        losses = [s * (p[2] / n) for s, p in zip(sums, preps)]
    else:
        losses = [focal_loss_mean(o, t, g, a)
                  for o, t, g, a in zip(outputs, targets, gammas, alphas)]

    loss1, loss2, loss3 = losses
    total = (task_weights[0] * loss1 + task_weights[1] * loss2 + task_weights[2] * loss3)
    return total, loss1, loss2, loss3


# ---------------------------------------------------------------------------
# pure-JAX reference (mirrors the PyTorch forward)
# ---------------------------------------------------------------------------
def _focal_loss_mean_ref(logits, targets, gamma=2.0, alpha=None):
    log_prob = jax.nn.log_softmax(logits.astype(jnp.float32), axis=-1)
    t = jnp.asarray(targets).astype(jnp.int32)[:, None]
    log_pt = jnp.take_along_axis(log_prob, t, axis=1)
    pt = jnp.exp(log_pt)
    if alpha is None:
        weight = (1.0 - pt) ** gamma
    elif isinstance(alpha, (int, float)):
        weight = alpha * (1.0 - pt) ** gamma
    else:
        batch_alpha = jnp.asarray(alpha, jnp.float32)[t[:, 0]][:, None]
        weight = batch_alpha * (1.0 - pt) ** gamma
    return jnp.mean(-weight * log_pt)


if __name__ == "__main__":
    key = jax.random.PRNGKey(0)
    N, C = 200, 8   # num_classes=8 (module default); N deliberately NOT a multiple of 128/C

    k = jax.random.split(key, 7)
    x1 = jax.random.normal(k[0], (N, C), dtype=jnp.float32)
    x2 = jax.random.normal(k[1], (N, C), dtype=jnp.float32)
    x3 = jax.random.normal(k[2], (N, C), dtype=jnp.float32)
    t1 = jax.random.randint(k[3], (N,), 0, C, dtype=jnp.int32)
    t2 = jax.random.randint(k[4], (N,), 0, C, dtype=jnp.int32)
    t3 = jax.random.randint(k[5], (N,), 0, C, dtype=jnp.int32)

    total, l1, l2, l3 = multitask_focal_loss(x1, t1, x2, t2, x3, t3)
    jax.block_until_ready((total, l1, l2, l3))

    r1 = _focal_loss_mean_ref(x1, t1)
    r2 = _focal_loss_mean_ref(x2, t2)
    r3 = _focal_loss_mean_ref(x3, t3)
    r_total = (r1 + r2 + r3) / 3.0
    assert jnp.allclose(l1, r1, atol=1e-5, rtol=1e-5), (l1, r1)
    assert jnp.allclose(l2, r2, atol=1e-5, rtol=1e-5), (l2, r2)
    assert jnp.allclose(l3, r3, atol=1e-5, rtol=1e-5), (l3, r3)
    assert jnp.allclose(total, r_total, atol=1e-5, rtol=1e-5), (total, r_total)

    # single task: zero-copy reshape path (N % 16 == 0), ragged last block, per-class alpha
    N2 = 720
    x4 = jax.random.normal(k[6], (N2, C), dtype=jnp.float32)
    t4 = jax.random.randint(jax.random.PRNGKey(1), (N2,), 0, C, dtype=jnp.int32)
    alpha_vec = jnp.linspace(0.5, 1.5, C, dtype=jnp.float32)
    l4 = focal_loss_mean(x4, t4, gamma=2.0, alpha=alpha_vec)
    jax.block_until_ready(l4)
    r4 = _focal_loss_mean_ref(x4, t4, gamma=2.0, alpha=alpha_vec)
    assert jnp.allclose(l4, r4, atol=1e-5, rtol=1e-5), (l4, r4)

    # multi-block / 2-chunk (megacore) grid path, forced small tile, duplicated-block clamp
    N3 = 4000
    x5 = jax.random.normal(jax.random.PRNGKey(2), (N3, C), dtype=jnp.float32)
    t5 = jax.random.randint(jax.random.PRNGKey(3), (N3,), 0, C, dtype=jnp.int32)
    x5s, w5s, _ = _prepare_task(x5, t5, None)
    s5 = _fused_focal_sums([x5s], [w5s], C, 2.0, max_tile_rows=64)[0]
    l5 = s5 / N3
    jax.block_until_ready(l5)
    r5 = _focal_loss_mean_ref(x5, t5)
    assert jnp.allclose(l5, r5, atol=1e-5, rtol=1e-5), (l5, r5)

    print("KERNEL_OK")
</pallas_src>

<mosaic_0001>
module attributes {stable_mosaic.version = 11 : i64} {
  func.func @probe(%arg0: memref<8x128xf32, #tpu.memory_space<vmem>>, %arg1: memref<8x128xf32, #tpu.memory_space<vmem>>) attributes {dimension_semantics = [], scalar_prefetch = 0 : i64, scratch_operands = 0 : i64, tpu.core_type = #tpu.core_type<tc>} {
    %c0 = arith.constant 0 : index
    %c0_0 = arith.constant 0 : index
    %0 = vector.load %arg0[%c0, %c0_0] : memref<8x128xf32, #tpu.memory_space<vmem>>, vector<8x128xf32>
    %c1_i32 = arith.constant 1 : i32
    %1 = tpu.dynamic_rotate %0 by %c1_i32 dim 1 : vector<8x128xf32>, i32 -> vector<8x128xf32>
    %c0_1 = arith.constant 0 : index
    %c0_2 = arith.constant 0 : index
    %2 = vector.load %arg1[%c0_1, %c0_2] : memref<8x128xf32, #tpu.memory_space<vmem>>, vector<8x128xf32>
    tpu.vector_store %arg1[%c0_1, %c0_2], %1 {strides = array<i32>} : memref<8x128xf32, #tpu.memory_space<vmem>>, vector<8x128xf32>,
    return
  }
}

</mosaic_0001>

<bundles_post_ra>
// kernel: tpu_custom_call.1
= control target key start
LH: loop header
LB: loop body
LE: loop exit
PB: predicated region body
PF: predicated region fallthrough
CT: control target
= control target key end

     0   :  { %6 = vsyncpa [#allocation3], 0  ;;  %s128_s0 = inlined_call_operand.hbm [shape: f32[8,128], index: 0, kind: input, shape index: {}]   ;;  %s129_s1 = inlined_call_operand.hbm [shape: f32[8,128], index: 1, kind: output, shape index: {}]  }
   0x1   :  { %7 = vsyncpa [#allocation4], 0  ;;  %s91_s6 = smov [#allocation2]   ;;  %s43_s10 = scalar_lea.hbm %s128_s0, 128 }
   0x2   :  { %s14_s7 = sshll.u32 %s91_s6, 4  ;;  %p44_p0 = scmp.ne.s32.totalorder %s128_s0, %s43_s10  ;;  %s15_s7 = int_to_ptr.vmem [resolvable:$true] %s14_s7 }
   0x3   :  { %p47_p1 = scmp.lt.u32.totalorder %s43_s10, %s128_s0 }
   0x5   :  { %p49_p2 = pnand %p47_p1, %p44_p0 }
   0x7   :  { %52 = shalt.err (!%p49_p2)
}
   0x8   :  { %s53_s15 = scalar_lea.vmem %s15_s7, 128  ;;  %p58_p4 = scmp.lt.s32.totalorder %s15_s7, %s15_s7 }
   0x9   :  { %p54_p3 = scmp.ne.s32.totalorder %s15_s7, %s53_s15  ;;  %p59_p5 = scmp.lt.s32.totalorder %s53_s15, %s53_s15 }
   0xb   :  { %p60_p6 = por %p59_p5, %p58_p4 }
   0xd   :  { %p61_p7 = pnand %p60_p6, %p54_p3 }
   0xf   :  { %64 = shalt.err (!%p61_p7)
}
  0x10   :  { %17 = dma.hbm_to_vmem [thread:$0]  %s128_s0, 128, %s15_s7, [#allocation3]  }
  0x11   :  { %87 = dma.done.wait [#allocation3], 128  }
  0x12   :  { %88 = vsyncadd [#allocation3], 4294967168  ;;  %v21_v0 = vld [vmem:[#allocation2] sm:$0xff]  ;;  %s92_s18 = smov 1   ;;  %s93_s19 = smov [#allocation5]  }
  0x13   :  { %22 = vrot.lane.b32.xlu0 %v21_v0, %s92_s18  ;;  %s31_s20 = sshll.u32 %s93_s19, 4  ;;  %s32_s20 = int_to_ptr.vmem [resolvable:$true] %s31_s20 }
  0x14   :  { %s65_s21 = scalar_lea.vmem %s32_s20, 128  ;;  %p70_p9 = scmp.lt.s32.totalorder %s32_s20, %s32_s20 }
  0x15   :  { %p66_p8 = scmp.ne.s32.totalorder %s32_s20, %s65_s21  ;;  %p71_p10 = scmp.lt.s32.totalorder %s65_s21, %s65_s21 }
  0x17   :  { %p72_p11 = por %p71_p10, %p70_p9 }
  0x19   :  { %p73_p12 = pnand %p72_p11, %p66_p8 }
  0x85   :  { %v23_v1 = vpop.permute.xlu0 %22 }
  0x86   :  { %24 = vst [vmem:[#allocation5] sm:$0xff] %v23_v1 }
  0x87   :  { %76 = shalt.err (!%p73_p12)
}
  0x88   :  { %s77_s0 = scalar_lea.hbm %s129_s1, 128 }
  0x89   :  { %p78_p13 = scmp.ne.s32.totalorder %s129_s1, %s77_s0  ;;  %p81_p0 = scmp.lt.u32.totalorder %s77_s0, %s129_s1 }
  0x8b   :  { %p83_p1 = pnand %p81_p0, %p78_p13 }
  0x8d   :  { %86 = shalt.err (!%p83_p1)
}
  0x8e   :  { %34 = dma.vmem_to_hbm [thread:$0]  %s32_s20, 128, %s129_s1, [#allocation4]  }
  0x8f   :  { %89 = dma.done.wait [#allocation4], 128  }
  0x90   :  { %90 = vsyncadd [#allocation4], 4294967168 }
  0x91   :  { %38 = vsyncpa [#allocation3], 1 }
  0x92   :  { %39 = vsyncpa [#allocation4], 1 }

</bundles_post_ra>
